<compile_context>
chip_gen: v7x
topology: tpu7x:2x2x1
jax: 0.10.0
libtpu: 0.0.40
codegen_flags: <defaults>
</compile_context>

<pallas_src>
import functools

import jax
import jax.numpy as jnp
from jax.experimental import pallas as pl


def _attn_kernel(x_ref, w_ref, mask_ref, o_ref, *, num_batches, seq_len,
                 num_hops, head_dim):
    # x_ref:    (B*S, D)      all batches' input rows, batch-major
    # w_ref:    (D, 3*H*dh)   fused [Wq_all | Wk_all | Wv_all]
    # mask_ref: (B, S)        1.0 = valid key position, 0.0 = masked
    # o_ref:    (B, S, H*dh)  output slab, written once
    B, S, H, dh = num_batches, seq_len, num_hops, head_dim
    E = H * dh

    # One fused projection for all batches, hops and Q/K/V (single lane-dense MXU pass).
    qkv = jnp.dot(x_ref[...], w_ref[...],
                  preferred_element_type=jnp.float32)        # [B*S, 3E]
    qkv = qkv.reshape(B, S, 3 * E)      # sublane-aligned split of the row axis (cheap)

    scale = 1.0 / (float(dh) ** 0.5)
    q = qkv[..., :E] * scale            # fold 1/sqrt(dh) into q
    k = qkv[..., E:2 * E]
    v = qkv[..., 2 * E:]

    # Key-axis mask, hoisted out of the hop loop: [B, 1, S] broadcasts over query rows.
    neg = (10000.0 * (1.0 - mask_ref[...]))[:, None, :]

    outs = []
    for h in range(H):                  # static unroll (H is small)
        sl = slice(h * dh, (h + 1) * dh)
        qh, kh, vh = q[..., sl], k[..., sl], v[..., sl]      # [B, S, dh] each
        # scores = (q*scale) @ k^T, batched over B (contract over dh; no k^T materialized).
        s = jnp.einsum('bqd,bkd->bqk', qh, kh,
                       preferred_element_type=jnp.float32)   # [B, S, S]
        # No max-subtraction: tanh bounds valid scores to [-1, 1]; masked exp underflows to 0.
        e = jnp.exp(jnp.tanh(s) - neg)
        l = jnp.sum(e, axis=-1, keepdims=True)               # [B, S, 1]
        av = jnp.einsum('bqk,bkd->bqd', e, vh,
                        preferred_element_type=jnp.float32)  # [B, S, dh]
        outs.append(av * pl.reciprocal(l, approx=False))     # per-row normalization, post-AV

    o_ref[...] = jnp.concatenate(outs, axis=-1).astype(o_ref.dtype)   # [B, S, E]


def multihop_attention(x_sbd, wq, wk, wv, mask):
    """x_sbd: [S, B, D] (PyTorch layout), wq/wk/wv: [H, D, dh] (pre-transposed for x @ W),
    mask: [B, S] (1 = valid key, 0 = padded).  Returns [S, B, H*dh]."""
    S, B, D = x_sbd.shape
    H, _, dh = wq.shape
    E = H * dh

    # Fused weight: columns = [ Wq_h0 .. Wq_h{H-1} | Wk_h0 .. | Wv_h0 .. ]  -> (D, 3E)
    def _flat(w):  # [H, D, dh] -> [D, H*dh]
        return jnp.transpose(w, (1, 0, 2)).reshape(D, H * dh)

    w_fused = jnp.concatenate([_flat(wq), _flat(wk), _flat(wv)], axis=1)  # [D, 3E]

    # Tiny layout changes are left to XLA in the wrapper (see header comment).
    x_flat = jnp.transpose(x_sbd, (1, 0, 2)).reshape(B * S, D)            # [B*S, D]

    kernel = functools.partial(_attn_kernel, num_batches=B, seq_len=S,
                               num_hops=H, head_dim=dh)

    out_bse = pl.pallas_call(
        kernel,
        out_shape=jax.ShapeDtypeStruct((B, S, E), jnp.float32),
        grid=(1,),                                        # whole problem fits VMEM: one step
        in_specs=[
            pl.BlockSpec((B * S, D), lambda i: (0, 0)),   # x, all batches, single DMA
            pl.BlockSpec((D, 3 * E), lambda i: (0, 0)),   # fused W
            pl.BlockSpec((B, S), lambda i: (0, 0)),       # mask
        ],
        out_specs=pl.BlockSpec((B, S, E), lambda i: (0, 0, 0)),
    )(x_flat, w_fused, mask)

    return jnp.transpose(out_bse, (1, 0, 2))              # [S, B, H*dh]


def reference_attention(x_sbd, wq, wk, wv, mask):
    """Pure-JAX reference mirroring the PyTorch forward (dropout = identity)."""
    S, B, D = x_sbd.shape
    H, _, dh = wq.shape
    outs = []
    for h in range(H):
        q = jnp.einsum("sbd,de->sbe", x_sbd, wq[h])   # [S,B,dh]
        k = jnp.einsum("sbd,de->sbe", x_sbd, wk[h])
        v = jnp.einsum("sbd,de->sbe", x_sbd, wv[h])
        qb = jnp.transpose(q, (1, 0, 2))              # [B,S,dh]
        kb = jnp.transpose(k, (1, 2, 0))              # [B,dh,S]
        vb = jnp.transpose(v, (1, 0, 2))              # [B,S,dh]
        mask_ = 1.0 - jnp.broadcast_to(mask[:, None, :], (B, S, S))
        align = jnp.tanh(jnp.matmul(qb, kb) / (dh ** 0.5)) - 10000.0 * mask_
        align = jax.nn.softmax(align, axis=2)
        outs.append(jnp.transpose(jnp.matmul(align, vb), (1, 0, 2)))  # [S,B,dh]
    return jnp.concatenate(outs, axis=2)


if __name__ == "__main__":
    # Small shapes consistent with the module: seq=8, batch=2, inp_size=32, hops=4
    S, B, D, H = 8, 2, 32, 4
    dh = D // H

    key = jax.random.PRNGKey(0)
    kx, kq, kk, kv = jax.random.split(key, 4)

    x = jax.random.normal(kx, (S, B, D), dtype=jnp.float32)          # [S, B, D]
    # nn.Linear weights are [out, in]; store pre-transposed as [H, D, dh] for x @ W.
    bound = 1.0 / (D ** 0.5)
    wq = jax.random.uniform(kq, (H, D, dh), jnp.float32, -bound, bound)
    wk = jax.random.uniform(kk, (H, D, dh), jnp.float32, -bound, bound)
    wv = jax.random.uniform(kv, (H, D, dh), jnp.float32, -bound, bound)

    # mask: 1 = valid key, 0 = padded key (last two positions padded)
    mask = jnp.ones((B, S), dtype=jnp.float32).at[:, -2:].set(0.0)

    out = multihop_attention(x, wq, wk, wv, mask)
    out = jax.block_until_ready(out)

    ref = reference_attention(x, wq, wk, wv, mask)
    assert out.shape == (S, B, D), out.shape
    assert jnp.allclose(out, ref, atol=1e-4, rtol=1e-4), "mismatch vs reference"

    print("KERNEL_OK")
</pallas_src>

<mosaic_0001>
module attributes {stable_mosaic.version = 11 : i64} {
  func.func @_attn_kernel(%arg0: i32, %arg1: memref<16x32xf32, #tpu.memory_space<vmem>>, %arg2: memref<32x96xf32, #tpu.memory_space<vmem>>, %arg3: memref<2x8xf32, #tpu.memory_space<vmem>>, %arg4: memref<2x8x32xf32, #tpu.memory_space<vmem>>) attributes {dimension_semantics = [#tpu.dimension_semantics<arbitrary>], iteration_bounds = array<i64: 1>, scalar_prefetch = 0 : i64, scratch_operands = 0 : i64, tpu.core_type = #tpu.core_type<tc>, window_params = [{pipeline_mode = #tpu.pipeline_mode<synchronous>, transform_indices = @transform_0, window_bounds = array<i64: 16, 32>}, {pipeline_mode = #tpu.pipeline_mode<synchronous>, transform_indices = @transform_1, window_bounds = array<i64: 32, 96>}, {pipeline_mode = #tpu.pipeline_mode<synchronous>, transform_indices = @transform_2, window_bounds = array<i64: 2, 8>}, {pipeline_mode = #tpu.pipeline_mode<synchronous>, transform_indices = @transform_3, window_bounds = array<i64: 2, 8, 32>}]} {
    %c0 = arith.constant 0 : index
    %c0_0 = arith.constant 0 : index
    %0 = vector.load %arg1[%c0, %c0_0] : memref<16x32xf32, #tpu.memory_space<vmem>>, vector<16x32xf32>
    %c0_1 = arith.constant 0 : index
    %c0_2 = arith.constant 0 : index
    %1 = vector.load %arg2[%c0_1, %c0_2] : memref<32x96xf32, #tpu.memory_space<vmem>>, vector<32x96xf32>
    %cst = arith.constant dense<0.000000e+00> : vector<16x96xf32>
    %2 = tpu.matmul %0, %1, %cst {dimension_numbers = #tpu.dot_dimension_numbers<[1], [0], [0], [1], [0, 0, 1, 1], [], []>} : vector<16x32xf32>, vector<32x96xf32>, vector<16x96xf32> -> vector<16x96xf32>
    %3 = vector.shape_cast %2 : vector<16x96xf32> to vector<2x8x96xf32>
    %4 = vector.extract_strided_slice %3 {offsets = [0, 0, 0], sizes = [2, 8, 32], strides = [1, 1, 1]} : vector<2x8x96xf32> to vector<2x8x32xf32>
    %cst_3 = arith.constant 0.353553385 : f32
    %5 = vector.broadcast %cst_3 : f32 to vector<2x8x32xf32>
    %6 = arith.mulf %4, %5 : vector<2x8x32xf32>
    %7 = vector.extract_strided_slice %3 {offsets = [0, 0, 32], sizes = [2, 8, 32], strides = [1, 1, 1]} : vector<2x8x96xf32> to vector<2x8x32xf32>
    %8 = vector.extract_strided_slice %3 {offsets = [0, 0, 64], sizes = [2, 8, 32], strides = [1, 1, 1]} : vector<2x8x96xf32> to vector<2x8x32xf32>
    %c0_4 = arith.constant 0 : index
    %c0_5 = arith.constant 0 : index
    %9 = vector.load %arg3[%c0_4, %c0_5] : memref<2x8xf32, #tpu.memory_space<vmem>>, vector<2x8xf32>
    %cst_6 = arith.constant 1.000000e+00 : f32
    %10 = vector.broadcast %cst_6 : f32 to vector<2x8xf32>
    %11 = arith.subf %10, %9 : vector<2x8xf32>
    %cst_7 = arith.constant 1.000000e+04 : f32
    %12 = vector.broadcast %cst_7 : f32 to vector<2x8xf32>
    %13 = arith.mulf %12, %11 : vector<2x8xf32>
    %14 = vector.shape_cast %13 : vector<2x8xf32> to vector<2x1x8xf32>
    %15 = vector.extract_strided_slice %6 {offsets = [0, 0, 0], sizes = [2, 8, 8], strides = [1, 1, 1]} : vector<2x8x32xf32> to vector<2x8x8xf32>
    %16 = vector.extract_strided_slice %7 {offsets = [0, 0, 0], sizes = [2, 8, 8], strides = [1, 1, 1]} : vector<2x8x32xf32> to vector<2x8x8xf32>
    %17 = vector.extract_strided_slice %8 {offsets = [0, 0, 0], sizes = [2, 8, 8], strides = [1, 1, 1]} : vector<2x8x32xf32> to vector<2x8x8xf32>
    "tpu.trace_start"() <{level = 10 : i32, message = "bqd,bkd->bqk"}> : () -> ()
    %cst_8 = arith.constant dense<0.000000e+00> : vector<2x8x8xf32>
    %18 = tpu.matmul %15, %16, %cst_8 {dimension_numbers = #tpu.dot_dimension_numbers<[2], [2], [1], [1], [0, 0, 0, 1, 1, 1], [0], [0]>} : vector<2x8x8xf32>, vector<2x8x8xf32>, vector<2x8x8xf32> -> vector<2x8x8xf32>
    "tpu.trace_stop"() : () -> ()
    %19 = math.tanh %18 : vector<2x8x8xf32>
    %20 = vector.broadcast %14 : vector<2x1x8xf32> to vector<2x8x8xf32>
    %21 = arith.subf %19, %20 : vector<2x8x8xf32>
    %22 = math.exp %21 : vector<2x8x8xf32>
    %cst_9 = arith.constant dense<0.000000e+00> : vector<2x8xf32>
    %23 = vector.multi_reduction <add>, %22, %cst_9 [2] : vector<2x8x8xf32> to vector<2x8xf32>
    %24 = vector.shape_cast %23 : vector<2x8xf32> to vector<2x8x1xf32>
    "tpu.trace_start"() <{level = 10 : i32, message = "bqk,bkd->bqd"}> : () -> ()
    %cst_10 = arith.constant dense<0.000000e+00> : vector<2x8x8xf32>
    %25 = tpu.matmul %22, %17, %cst_10 {dimension_numbers = #tpu.dot_dimension_numbers<[2], [1], [1], [2], [0, 0, 0, 1, 1, 2], [0], [0]>} : vector<2x8x8xf32>, vector<2x8x8xf32>, vector<2x8x8xf32> -> vector<2x8x8xf32>
    "tpu.trace_stop"() : () -> ()
    %26 = tpu.reciprocal %24 : vector<2x8x1xf32> -> vector<2x8x1xf32>
    %27 = vector.broadcast %26 : vector<2x8x1xf32> to vector<2x8x8xf32>
    %28 = arith.mulf %25, %27 : vector<2x8x8xf32>
    %29 = vector.extract_strided_slice %6 {offsets = [0, 0, 8], sizes = [2, 8, 8], strides = [1, 1, 1]} : vector<2x8x32xf32> to vector<2x8x8xf32>
    %30 = vector.extract_strided_slice %7 {offsets = [0, 0, 8], sizes = [2, 8, 8], strides = [1, 1, 1]} : vector<2x8x32xf32> to vector<2x8x8xf32>
    %31 = vector.extract_strided_slice %8 {offsets = [0, 0, 8], sizes = [2, 8, 8], strides = [1, 1, 1]} : vector<2x8x32xf32> to vector<2x8x8xf32>
    "tpu.trace_start"() <{level = 10 : i32, message = "bqd,bkd->bqk"}> : () -> ()
    %cst_11 = arith.constant dense<0.000000e+00> : vector<2x8x8xf32>
    %32 = tpu.matmul %29, %30, %cst_11 {dimension_numbers = #tpu.dot_dimension_numbers<[2], [2], [1], [1], [0, 0, 0, 1, 1, 1], [0], [0]>} : vector<2x8x8xf32>, vector<2x8x8xf32>, vector<2x8x8xf32> -> vector<2x8x8xf32>
    "tpu.trace_stop"() : () -> ()
    %33 = math.tanh %32 : vector<2x8x8xf32>
    %34 = vector.broadcast %14 : vector<2x1x8xf32> to vector<2x8x8xf32>
    %35 = arith.subf %33, %34 : vector<2x8x8xf32>
    %36 = math.exp %35 : vector<2x8x8xf32>
    %cst_12 = arith.constant dense<0.000000e+00> : vector<2x8xf32>
    %37 = vector.multi_reduction <add>, %36, %cst_12 [2] : vector<2x8x8xf32> to vector<2x8xf32>
    %38 = vector.shape_cast %37 : vector<2x8xf32> to vector<2x8x1xf32>
    "tpu.trace_start"() <{level = 10 : i32, message = "bqk,bkd->bqd"}> : () -> ()
    %cst_13 = arith.constant dense<0.000000e+00> : vector<2x8x8xf32>
    %39 = tpu.matmul %36, %31, %cst_13 {dimension_numbers = #tpu.dot_dimension_numbers<[2], [1], [1], [2], [0, 0, 0, 1, 1, 2], [0], [0]>} : vector<2x8x8xf32>, vector<2x8x8xf32>, vector<2x8x8xf32> -> vector<2x8x8xf32>
    "tpu.trace_stop"() : () -> ()
    %40 = tpu.reciprocal %38 : vector<2x8x1xf32> -> vector<2x8x1xf32>
    %41 = vector.broadcast %40 : vector<2x8x1xf32> to vector<2x8x8xf32>
    %42 = arith.mulf %39, %41 : vector<2x8x8xf32>
    %43 = vector.extract_strided_slice %6 {offsets = [0, 0, 16], sizes = [2, 8, 8], strides = [1, 1, 1]} : vector<2x8x32xf32> to vector<2x8x8xf32>
    %44 = vector.extract_strided_slice %7 {offsets = [0, 0, 16], sizes = [2, 8, 8], strides = [1, 1, 1]} : vector<2x8x32xf32> to vector<2x8x8xf32>
    %45 = vector.extract_strided_slice %8 {offsets = [0, 0, 16], sizes = [2, 8, 8], strides = [1, 1, 1]} : vector<2x8x32xf32> to vector<2x8x8xf32>
    "tpu.trace_start"() <{level = 10 : i32, message = "bqd,bkd->bqk"}> : () -> ()
    %cst_14 = arith.constant dense<0.000000e+00> : vector<2x8x8xf32>
    %46 = tpu.matmul %43, %44, %cst_14 {dimension_numbers = #tpu.dot_dimension_numbers<[2], [2], [1], [1], [0, 0, 0, 1, 1, 1], [0], [0]>} : vector<2x8x8xf32>, vector<2x8x8xf32>, vector<2x8x8xf32> -> vector<2x8x8xf32>
    "tpu.trace_stop"() : () -> ()
    %47 = math.tanh %46 : vector<2x8x8xf32>
    %48 = vector.broadcast %14 : vector<2x1x8xf32> to vector<2x8x8xf32>
    %49 = arith.subf %47, %48 : vector<2x8x8xf32>
    %50 = math.exp %49 : vector<2x8x8xf32>
    %cst_15 = arith.constant dense<0.000000e+00> : vector<2x8xf32>
    %51 = vector.multi_reduction <add>, %50, %cst_15 [2] : vector<2x8x8xf32> to vector<2x8xf32>
    %52 = vector.shape_cast %51 : vector<2x8xf32> to vector<2x8x1xf32>
    "tpu.trace_start"() <{level = 10 : i32, message = "bqk,bkd->bqd"}> : () -> ()
    %cst_16 = arith.constant dense<0.000000e+00> : vector<2x8x8xf32>
    %53 = tpu.matmul %50, %45, %cst_16 {dimension_numbers = #tpu.dot_dimension_numbers<[2], [1], [1], [2], [0, 0, 0, 1, 1, 2], [0], [0]>} : vector<2x8x8xf32>, vector<2x8x8xf32>, vector<2x8x8xf32> -> vector<2x8x8xf32>
    "tpu.trace_stop"() : () -> ()
    %54 = tpu.reciprocal %52 : vector<2x8x1xf32> -> vector<2x8x1xf32>
    %55 = vector.broadcast %54 : vector<2x8x1xf32> to vector<2x8x8xf32>
    %56 = arith.mulf %53, %55 : vector<2x8x8xf32>
    %57 = vector.extract_strided_slice %6 {offsets = [0, 0, 24], sizes = [2, 8, 8], strides = [1, 1, 1]} : vector<2x8x32xf32> to vector<2x8x8xf32>
    %58 = vector.extract_strided_slice %7 {offsets = [0, 0, 24], sizes = [2, 8, 8], strides = [1, 1, 1]} : vector<2x8x32xf32> to vector<2x8x8xf32>
    %59 = vector.extract_strided_slice %8 {offsets = [0, 0, 24], sizes = [2, 8, 8], strides = [1, 1, 1]} : vector<2x8x32xf32> to vector<2x8x8xf32>
    "tpu.trace_start"() <{level = 10 : i32, message = "bqd,bkd->bqk"}> : () -> ()
    %cst_17 = arith.constant dense<0.000000e+00> : vector<2x8x8xf32>
    %60 = tpu.matmul %57, %58, %cst_17 {dimension_numbers = #tpu.dot_dimension_numbers<[2], [2], [1], [1], [0, 0, 0, 1, 1, 1], [0], [0]>} : vector<2x8x8xf32>, vector<2x8x8xf32>, vector<2x8x8xf32> -> vector<2x8x8xf32>
    "tpu.trace_stop"() : () -> ()
    %61 = math.tanh %60 : vector<2x8x8xf32>
    %62 = vector.broadcast %14 : vector<2x1x8xf32> to vector<2x8x8xf32>
    %63 = arith.subf %61, %62 : vector<2x8x8xf32>
    %64 = math.exp %63 : vector<2x8x8xf32>
    %cst_18 = arith.constant dense<0.000000e+00> : vector<2x8xf32>
    %65 = vector.multi_reduction <add>, %64, %cst_18 [2] : vector<2x8x8xf32> to vector<2x8xf32>
    %66 = vector.shape_cast %65 : vector<2x8xf32> to vector<2x8x1xf32>
    "tpu.trace_start"() <{level = 10 : i32, message = "bqk,bkd->bqd"}> : () -> ()
    %cst_19 = arith.constant dense<0.000000e+00> : vector<2x8x8xf32>
    %67 = tpu.matmul %64, %59, %cst_19 {dimension_numbers = #tpu.dot_dimension_numbers<[2], [1], [1], [2], [0, 0, 0, 1, 1, 2], [0], [0]>} : vector<2x8x8xf32>, vector<2x8x8xf32>, vector<2x8x8xf32> -> vector<2x8x8xf32>
    "tpu.trace_stop"() : () -> ()
    %68 = tpu.reciprocal %66 : vector<2x8x1xf32> -> vector<2x8x1xf32>
    %69 = vector.broadcast %68 : vector<2x8x1xf32> to vector<2x8x8xf32>
    %70 = arith.mulf %67, %69 : vector<2x8x8xf32>
    %71 = tpu.concatenate %28, %42, %56, %70 in 2 : vector<2x8x8xf32>, vector<2x8x8xf32>, vector<2x8x8xf32>, vector<2x8x8xf32> -> vector<2x8x32xf32>
    %c0_20 = arith.constant 0 : index
    %c0_21 = arith.constant 0 : index
    %c0_22 = arith.constant 0 : index
    %72 = vector.load %arg4[%c0_20, %c0_21, %c0_22] : memref<2x8x32xf32, #tpu.memory_space<vmem>>, vector<2x8x32xf32>
    tpu.vector_store %arg4[%c0_20, %c0_21, %c0_22], %71 {strides = array<i32>} : memref<2x8x32xf32, #tpu.memory_space<vmem>>, vector<2x8x32xf32>,
    return
  }
  func.func @transform_0(%arg0: i32) -> (i32, i32) {
    %c0_i32 = arith.constant 0 : i32
    %c0_i32_0 = arith.constant 0 : i32
    %c0_i32_1 = arith.constant 0 : i32
    return %c0_i32, %c0_i32_0 : i32, i32
  }
  func.func @transform_1(%arg0: i32) -> (i32, i32) {
    %c0_i32 = arith.constant 0 : i32
    %c0_i32_0 = arith.constant 0 : i32
    %c0_i32_1 = arith.constant 0 : i32
    return %c0_i32, %c0_i32_0 : i32, i32
  }
  func.func @transform_2(%arg0: i32) -> (i32, i32) {
    %c0_i32 = arith.constant 0 : i32
    %c0_i32_0 = arith.constant 0 : i32
    %c0_i32_1 = arith.constant 0 : i32
    return %c0_i32, %c0_i32_0 : i32, i32
  }
  func.func @transform_3(%arg0: i32) -> (i32, i32, i32) {
    %c0_i32 = arith.constant 0 : i32
    %c0_i32_0 = arith.constant 0 : i32
    %c0_i32_1 = arith.constant 0 : i32
    %c0_i32_2 = arith.constant 0 : i32
    return %c0_i32, %c0_i32_0, %c0_i32_1 : i32, i32, i32
  }
}

</mosaic_0001>

<bundles_post_ra>
// kernel: tpu_custom_call.1
= control target key start
LH: loop header
LB: loop body
LE: loop exit
PB: predicated region body
PF: predicated region fallthrough
CT: control target
= control target key end

     0   :  { %8 = vsyncpa [#allocation3], 0  ;;  %s2039_s0 = inlined_call_operand.hbm [shape: f32[16,32], index: 0, kind: input, shape index: {}]   ;;  %s2040_s1 = inlined_call_operand.hbm [shape: f32[32,96], index: 1, kind: input, shape index: {}]   ;;  %s2041_s2 = inlined_call_operand.vmem [shape: f32[2,8], index: 2, kind: input, shape index: {}]   ;;  %s2042_s3 = inlined_call_operand.hbm [shape: f32[2,8,32], index: 3, kind: output, shape index: {}]  }
   0x1   :  { %9 = vsyncpa [#allocation6], 0 }
   0x2   :  { %10 = vsyncpa [#allocation4], 0  ;;  %s1830_s12 = smov [#allocation2]   ;;  %s1758_s16 = scalar_lea.hbm %s2039_s0, 256 }
   0x3   :  { %s16_s13 = sshll.u32 %s1830_s12, 4  ;;  %p1759_p0 = scmp.ne.s32.totalorder %s2039_s0, %s1758_s16  ;;  %s17_s13 = int_to_ptr.vmem [resolvable:$true] %s16_s13 }
   0x4   :  { %p1762_p1 = scmp.lt.u32.totalorder %s1758_s16, %s2039_s0 }
   0x6   :  { %p1764_p2 = pnand %p1762_p1, %p1759_p0 }
   0x8   :  { %1767 = shalt.err (!%p1764_p2)
}
   0x9   :  { %s1768_s21 = scalar_lea.vmem %s17_s13, 256  ;;  %p1773_p4 = scmp.lt.s32.totalorder %s17_s13, %s17_s13 }
   0xa   :  { %p1769_p3 = scmp.ne.s32.totalorder %s17_s13, %s1768_s21  ;;  %p1774_p5 = scmp.lt.s32.totalorder %s1768_s21, %s1768_s21 }
   0xc   :  { %p1775_p6 = por %p1774_p5, %p1773_p4 }
   0xe   :  { %p1776_p7 = pnand %p1775_p6, %p1769_p3 }
  0x10   :  { %1779 = shalt.err (!%p1776_p7)
}
  0x11   :  { %s1831_s22 = smov 128   ;;  %s1832_s23 = smov 8  }
  0x12   :  { %22 = dma.hbm_to_vmem [thread:$0]  %s2039_s0, 256, %s17_s13, [#allocation3], %s1831_s22, %s1831_s22, %s1832_s23  }
  0x13   :  { %s1833_s26 = smov [#allocation5]   ;;  %s1780_s30 = scalar_lea.hbm %s2040_s1, 512 }
  0x14   :  { %s28_s27 = sshll.u32 %s1833_s26, 4  ;;  %p1781_p8 = scmp.ne.s32.totalorder %s2040_s1, %s1780_s30  ;;  %s29_s27 = int_to_ptr.vmem [resolvable:$true] %s28_s27 }
  0x15   :  { %p1784_p9 = scmp.lt.u32.totalorder %s1780_s30, %s2040_s1 }
  0x17   :  { %p1786_p10 = pnand %p1784_p9, %p1781_p8 }
  0x19   :  { %1789 = shalt.err (!%p1786_p10)
}
  0x1a   :  { %s1790_s8 = scalar_lea.vmem %s29_s27, 512  ;;  %p1795_p12 = scmp.lt.s32.totalorder %s29_s27, %s29_s27 }
  0x1b   :  { %p1791_p11 = scmp.ne.s32.totalorder %s29_s27, %s1790_s8  ;;  %p1796_p13 = scmp.lt.s32.totalorder %s1790_s8, %s1790_s8 }
  0x1d   :  { %p1797_p0 = por %p1796_p13, %p1795_p12 }
  0x1f   :  { %p1798_p1 = pnand %p1797_p0, %p1791_p11 }
  0x21   :  { %1801 = shalt.err (!%p1798_p1)
}
  0x22   :  { %34 = dma.hbm_to_vmem [thread:$0]  %s2040_s1, 512, %s29_s27, [#allocation6], %s1831_s22, %s1831_s22, %s1832_s23  }
  0x23   :  { %1824 = dma.done.wait [#allocation3], 256  }
  0x24   :  { %1825 = vsyncadd [#allocation3], 4294967040 }
  0x25   :  { %1826 = dma.done.wait [#allocation6], 512  }
  0x26   :  { %1827 = vsyncadd [#allocation6], 4294966784  ;;  %vm49_vm0 = vcmask 261120   ;;  %v45_v0 = vld [vmem:[#allocation5] sm:$0xff]  ;;  %v46_v1 = vld [vmem:[#allocation5 + $0x8] sm:$0xff]  ;;  %v1834_v8 = vmov 0.0   ;;  %v140_v19 = vlaneseq }
  0x27   :  { %v47_v2 = vld [vmem:[#allocation5 + $0x10] sm:$0xff]  ;;  %v1681_v3 = vpack.c.bf16 %v46_v1, %v45_v0  ;;  %v48_v4 = vld [vmem:[#allocation5 + $0x18] sm:$0xff]  ;;  %1601 = vmatprep.subr.mxu1 %v1834_v8  ;;  %vm1835_vm1 = vmmov 0   ;;  %s1836_s1 = smov 64   ;;  %s1837_s10 = smov 96   ;;  %vm162_vm2 = vcmask 64512  }
  0x28   :  { %v43_v5 = vld [vmem:[#allocation2] sm:$0xff]  ;;  %v1685_v6 = vpack.c.bf16 %v48_v4, %v47_v2  ;;  %v44_v7 = vld [vmem:[#allocation2 + $0x8] sm:$0xff]  ;;  %1603 = vmatprep.mubr.msk.f32.mxu1 %vm1835_vm1, %v1834_v8  ;;  %s1838_s11 = smov 88   ;;  %s1839_s12 = smov 120   ;;  %v1847_v17 = vmov 1966171168  }
  0x29   :  { %1598 = vmatprep.mubr.msk.f32.mxu0 %vm49_vm0, %v43_v5  ;;  %1682 = vmatprep.subr.bf16.mxu0 %v1681_v3  ;;  %s1840_s13 = smov 56   ;;  %s1841_s14 = smov 80   ;;  %v138_v18 = vunpack.c.l.s4 %v1847_v17  ;;  %v133_v20 = vld [vmem:[%s2041_s2] sm:$0x3]  ;;  %v141_v23 = vshrl.u32 %v140_v19, 7  ;;  %vm1500_vm3 = vcmask 130048  }
  0x2a   :  { %1684 = vmatpush3.bf16.msra.mxu0 %v1681_v3  ;;  %s1842_s15 = smov 112   ;;  %s1843_s16 = smov 48   ;;  %v134_v21 = vsub.f32 1.0, %v133_v20  ;;  %vm1503_vm4 = vcmask 195584  }
  0x2b   :  { %1686 = vmatprep.subr.bf16.mxu0 %v1685_v6  ;;  %s1844_s17 = smov 72   ;;  %s1845_s18 = smov 104   ;;  %v139_v22 = vunpack.c.0.s8 %v138_v18  ;;  %v320_v30 = vsub.s32 0, %v141_v23 }
  0x2c   :  { %s1846_s19 = smov 40   ;;  %v135_v24 = vmul.f32 10000.0, %v134_v21  ;;  %s1848_s2 = smov 16  }
  0x2d   :  { %v142_v25 = vsub.s32 %v139_v22, %v141_v23  ;;  %s1849_s24 = smov 24   ;;  %s1850_s25 = smov [#allocation7]  }
  0x2e   :  { %1688 = vmatpush3.bf16.msra.mxu0 %v1685_v6  ;;  %s1513_s26 = sshll.u32 %s1850_s25, 4  ;;  %s1514_s26 = int_to_ptr.vmem [resolvable:$true] %s1513_s26 }
  0x2f   :  { %1611 = vmatprep.subr.mxu0 %v1834_v8  ;;  %v143_v26 = vrot.slane %v135_v24, %v142_v25  ;;  %s1802_s27 = scalar_lea.vmem %s1514_s26, 256  ;;  %p1807_p3 = scmp.lt.s32.totalorder %s1514_s26, %s1514_s26 }
  0x30   :  { %p1803_p2 = scmp.ne.s32.totalorder %s1514_s26, %s1802_s27  ;;  %p1808_p4 = scmp.lt.s32.totalorder %s1802_s27, %s1802_s27 }
  0x31   :  { %1599 = vmatmul.mubr.msk.f32.vlgmr.msra.gmra.mrb[0].mxu0 %vm49_vm0, %v44_v7  ;;  %v151_v29 = vrot.slane %v143_v26, %v142_v25  ;;  %v144_v31 = vcombine.high %v143_v26, %v143_v26 }
  0x32   :  { %1613 = vmatprep.mubr.msk.f32.mxu0 %vm1835_vm1, %v1834_v8  ;;  %p1809_p5 = por %p1808_p4, %p1807_p3 }
  0x33   :  { %v1924_v34 = vrot.slane %v151_v29, %v320_v30  ;;  %v158_v35 = vrot.slane %v144_v31, %v142_v25 }
  0x34   :  { %p1810_p6 = pnand %p1809_p5, %p1803_p2 }
  0x35   :  { %v1927_v38 = vrot.slane %v158_v35, %v320_v30 }
 0x104   :  { %v1600_v9 = vpop.f32.mrb[0].mxu0 }
 0x105   :  { %v122_v10 = vpop.f32.mrb[1].mxu0  ;;  %v132_v11 = vmul.f32 0.35355338, %v1600_v9 }
 0x106   :  { %340 = vrot.lane.b32.xlu1 %v122_v10, %s1836_s1  ;;  %160 = vrot.lane.b32.xlu0 %v122_v10, %s1837_s10  ;;  %v131_v12 = vmul.f32 0.35355338, %v122_v10 }
 0x10a   :  { %416 = vrot.lane.b32.xlu1 %v1600_v9, %s1836_s1  ;;  %239 = vrot.lane.b32.xlu0 %v1600_v9, %s1837_s10 }
 0x10e   :  { %576 = vrot.lane.b32.xlu1 %v1600_v9, %s1838_s11  ;;  %498 = vrot.lane.b32.xlu0 %v122_v10, %s1838_s11 }
 0x112   :  { %574 = vrot.lane.b32.xlu1 %v132_v11, %s1839_s12  ;;  %496 = vrot.lane.b32.xlu0 %v131_v12, %s1839_s12 }
 0x116   :  { %742 = vrot.lane.b32.xlu1 %v1600_v9, %s1840_s13  ;;  %666 = vrot.lane.b32.xlu0 %v122_v10, %s1840_s13 }
 0x11a   :  { %902 = vrot.lane.b32.xlu1 %v1600_v9, %s1841_s14  ;;  %824 = vrot.lane.b32.xlu0 %v122_v10, %s1841_s14 }
 0x11e   :  { %900 = vrot.lane.b32.xlu1 %v132_v11, %s1842_s15  ;;  %822 = vrot.lane.b32.xlu0 %v131_v12, %s1842_s15 }
 0x122   :  { %1068 = vrot.lane.b32.xlu1 %v1600_v9, %s1843_s16  ;;  %992 = vrot.lane.b32.xlu0 %v122_v10, %s1843_s16 }
 0x126   :  { %1228 = vrot.lane.b32.xlu1 %v1600_v9, %s1844_s17  ;;  %1150 = vrot.lane.b32.xlu0 %v122_v10, %s1844_s17 }
 0x12a   :  { %1226 = vrot.lane.b32.xlu1 %v132_v11, %s1845_s18  ;;  %1148 = vrot.lane.b32.xlu0 %v131_v12, %s1845_s18 }
 0x12e   :  { %1394 = vrot.lane.b32.xlu1 %v1600_v9, %s1846_s19  ;;  %1318 = vrot.lane.b32.xlu0 %v122_v10, %s1846_s19 }
 0x178   :  { %v341_v13 = vpop.permute.xlu1 %340  ;;  %v161_v14 = vpop.permute.xlu0 %160 }
 0x179   :  { %1602 = vmatpush3.xpose.msk.msra.mxu1 %vm162_vm2, %v161_v14  ;;  %1612 = vmatpush3.msra.mxu0 %v341_v13 }
 0x17a   :  { %1606 = vmatprep.subr.mxu1 %v1834_v8  ;;  %1621 = vmatprep.subr.mxu0 %v1834_v8 }
 0x17c   :  { %v240_v15 = vpop.permute.xlu0 %239  ;;  %1604 = vmatmul.mubr.msk.f32.vlgmr.msra.gmra.mrb[0].mxu1 %vm162_vm2, %v131_v12  ;;  %v417_v16 = vpop.permute.xlu1 %416 }
 0x17d   :  { %1607 = vmatpush3.xpose.msk.msra.mxu1 %vm162_vm2, %v240_v15  ;;  %1608 = vmatprep.mubr.msk.f32.mxu1 %vm1835_vm1, %v1834_v8 }
 0x17e   :  { %1616 = vmatprep.subr.mxu1 %v1834_v8 }
 0x180   :  { %1609 = vmatmul.mubr.msk.f32.vlgmr.msra.gmra.mrb[2].mxu1 %vm162_vm2, %v132_v11  ;;  %v499_v43 = vpop.permute.xlu0 %498  ;;  %v577_v44 = vpop.permute.xlu1 %576 }
 0x181   :  { %1617 = vmatpush3.msra.mxu1 %v417_v16  ;;  %1618 = vmatprep.mubr.msk.f32.mxu1 %vm1835_vm1, %v1834_v8 }
 0x182   :  { %1626 = vmatprep.subr.mxu1 %v1834_v8 }
 0x184   :  { %v497_v45 = vpop.permute.xlu0 %496  ;;  %v575_v47 = vpop.permute.xlu1 %574 }
 0x188   :  { %v667_v49 = vpop.permute.xlu0 %666  ;;  %v743_v50 = vpop.permute.xlu1 %742 }
 0x18c   :  { %v825_v1 = vpop.permute.xlu0 %824  ;;  %v903_v2 = vpop.permute.xlu1 %902 }
 0x190   :  { %v823_v3 = vpop.permute.xlu0 %822  ;;  %v901_v6 = vpop.permute.xlu1 %900 }
 0x194   :  { %v993_v9 = vpop.permute.xlu0 %992  ;;  %v1069_v11 = vpop.permute.xlu1 %1068 }
 0x198   :  { %v1151_v26 = vpop.permute.xlu0 %1150 }
 0x24f   :  { %v234_v27 = vpop.f32.mrb[0].mxu1 }
 0x250   :  { %1710 = vtanh.f32 %v234_v27  ;;  %v1605_v28 = vpop.f32.mrb[1].mxu1  ;;  %v1229_v27 = vpop.permute.xlu1 %1228 }
 0x251   :  { %v1149_v28 = vpop.permute.xlu0 %1148 }
 0x253   :  { %v312_v32 = vpop.f32.mrb[2].mxu1 }
 0x254   :  { %1712 = vtanh.f32 %v312_v32  ;;  %v1610_v33 = vpop.f32.mrb[3].mxu1  ;;  %v1227_v31 = vpop.permute.xlu1 %1226 }
 0x255   :  { %v1319_v33 = vpop.permute.xlu0 %1318 }
 0x25a   :  { %v1711_v36 = vpop.eup %1710 }
 0x25b   :  { %v328_v37 = vsub.f32 %v1711_v36, %v1924_v34  ;;  %v1395_v36 = vpop.permute.xlu1 %1394 }
 0x25d   :  { %v330_v39 = vmul.f32 1.442695, %v328_v37 }
 0x25e   :  { %v1713_v40 = vpop.eup %1712 }
 0x25f   :  { %1714 = vpow2.f32 %v330_v39  ;;  %v329_v41 = vsub.f32 %v1713_v40, %v1927_v38 }
 0x261   :  { %v332_v42 = vmul.f32 1.442695, %v329_v41 }
 0x263   :  { %1716 = vpow2.f32 %v332_v42 }
 0x269   :  { %v1930_v46 = vpop.eup %1714 }
 0x26a   :  { %1614 = vmatmul.mubr.msk.f32.vlgmr.msra.gmra.mrb[2].mxu0 %vm162_vm2, %v1930_v46 }
 0x26b   :  { %1622 = vmatpush3.xpose.msk.msra.mxu0 %vm162_vm2, %v499_v43  ;;  %1623 = vmatprep.mubr.msk.f32.mxu0 %vm1835_vm1, %v1834_v8 }
 0x26c   :  { %1631 = vmatprep.subr.mxu0 %v1834_v8 }
 0x26d   :  { %v1938_v48 = vpop.eup %1716 }
 0x26e   :  { %1619 = vmatmul.mubr.msk.f32.vlgmr.msra.gmra.mrb[4].mxu1 %vm162_vm2, %v1938_v48  ;;  %1624 = vmatmul.mubr.msk.f32.vlgmr.msra.gmra.mrb[4].mxu0 %vm162_vm2, %v497_v45 }
 0x26f   :  { %1627 = vmatpush3.xpose.msk.msra.mxu1 %vm162_vm2, %v577_v44  ;;  %1632 = vmatpush3.msra.mxu0 %v667_v49 }
 0x270   :  { %1628 = vmatprep.mubr.msk.f32.mxu1 %vm1835_vm1, %v1834_v8  ;;  %1636 = vmatprep.subr.mxu1 %v1834_v8 }
 0x271   :  { %1633 = vmatprep.mubr.msk.f32.mxu0 %vm1835_vm1, %v1834_v8  ;;  %1641 = vmatprep.subr.mxu0 %v1834_v8 }
 0x272   :  { %1629 = vmatmul.mubr.msk.f32.vlgmr.msra.gmra.mrb[6].mxu1 %vm162_vm2, %v575_v47 }
 0x273   :  { %1637 = vmatpush3.msra.mxu1 %v743_v50  ;;  %1638 = vmatprep.mubr.msk.f32.mxu1 %vm1835_vm1, %v1834_v8 }
 0x274   :  { %1646 = vmatprep.subr.mxu1 %v1834_v8 }
 0x33d   :  { %v1954_v51 = vpop.f32.mrb[2].mxu0 }
 0x33e   :  { %v1615_v52 = vpop.f32.mrb[3].mxu0 }
 0x341   :  { %v1956_v53 = vpop.f32.mrb[4].mxu1  ;;  %v570_v54 = vpop.f32.mrb[4].mxu0 }
 0x342   :  { %1718 = vtanh.f32 %v570_v54  ;;  %v1620_v55 = vpop.f32.mrb[5].mxu1  ;;  %v1625_v56 = vpop.f32.mrb[5].mxu0 }
 0x345   :  { %v648_v57 = vpop.f32.mrb[6].mxu1 }
 0x346   :  { %1720 = vtanh.f32 %v648_v57  ;;  %v1630_v58 = vpop.f32.mrb[7].mxu1 }
 0x34c   :  { %v1719_v59 = vpop.eup %1718 }
 0x34d   :  { %v654_v60 = vsub.f32 %v1719_v59, %v1924_v34 }
 0x34f   :  { %v656_v61 = vmul.f32 1.442695, %v654_v60  ;;  %v337_v60 = vsel %vm162_vm2, %v1938_v48, 0.0 }
 0x350   :  { %v1721_v62 = vpop.eup %1720 }
 0x351   :  { %1722 = vpow2.f32 %v656_v61  ;;  %v655_v63 = vsub.f32 %v1721_v62, %v1927_v38 }
 0x353   :  { %v658_v0 = vmul.f32 1.442695, %v655_v63 }
 0x355   :  { %1724 = vpow2.f32 %v658_v0 }
 0x35b   :  { %v1723_v4 = vpop.eup %1722 }
 0x35c   :  { %1634 = vmatmul.mubr.msk.f32.vlgmr.msra.gmra.mrb[6].mxu0 %vm162_vm2, %v1723_v4  ;;  %v660_v5 = vsel %vm162_vm2, %v1723_v4, 0.0 }
 0x35d   :  { %1642 = vmatpush3.xpose.msk.msra.mxu0 %vm162_vm2, %v825_v1  ;;  %661 = vadd.xlane.f32.xlu0 %v660_v5 }
 0x35e   :  { %1643 = vmatprep.mubr.msk.f32.mxu0 %vm1835_vm1, %v1834_v8  ;;  %1651 = vmatprep.subr.mxu0 %v1834_v8 }
 0x35f   :  { %v1725_v7 = vpop.eup %1724 }
 0x360   :  { %1639 = vmatmul.mubr.msk.f32.vlgmr.msra.gmra.mrb[8].mxu1 %vm162_vm2, %v1725_v7  ;;  %1644 = vmatmul.mubr.msk.f32.vlgmr.msra.gmra.mrb[8].mxu0 %vm162_vm2, %v823_v3  ;;  %v663_v10 = vsel %vm162_vm2, %v1725_v7, 0.0 }
 0x361   :  { %1647 = vmatpush3.xpose.msk.msra.mxu1 %vm162_vm2, %v903_v2  ;;  %1652 = vmatpush3.msra.mxu0 %v993_v9 }
 0x362   :  { %664 = vadd.xlane.f32.xlu1 %v663_v10  ;;  %1648 = vmatprep.mubr.msk.f32.mxu1 %vm1835_vm1, %v1834_v8 }
 0x363   :  { %1656 = vmatprep.subr.mxu1 %v1834_v8  ;;  %1653 = vmatprep.mubr.msk.f32.mxu0 %vm1835_vm1, %v1834_v8 }
 0x364   :  { %1649 = vmatmul.mubr.msk.f32.vlgmr.msra.gmra.mrb[10].mxu1 %vm162_vm2, %v901_v6  ;;  %1661 = vmatprep.subr.mxu0 %v1834_v8 }
 0x365   :  { %1657 = vmatpush3.msra.mxu1 %v1069_v11  ;;  %1658 = vmatprep.mubr.msk.f32.mxu1 %vm1835_vm1, %v1834_v8 }
 0x366   :  { %1666 = vmatprep.subr.mxu1 %v1834_v8 }
 0x3ea   :  { %v662_v58 = vpop.xlane.xlu0 %661 }
 0x3ef   :  { %v665_v62 = vpop.xlane.xlu1 %664 }
 0x42f   :  { %v1980_v12 = vpop.f32.mrb[6].mxu0 }
 0x430   :  { %v1635_v13 = vpop.f32.mrb[7].mxu0 }
 0x433   :  { %v1982_v14 = vpop.f32.mrb[8].mxu1  ;;  %v896_v15 = vpop.f32.mrb[8].mxu0 }
 0x434   :  { %1726 = vtanh.f32 %v896_v15  ;;  %v1640_v16 = vpop.f32.mrb[9].mxu1  ;;  %v1645_v17 = vpop.f32.mrb[9].mxu0 }
 0x437   :  { %v974_v18 = vpop.f32.mrb[10].mxu1 }
 0x438   :  { %1728 = vtanh.f32 %v974_v18  ;;  %v1650_v19 = vpop.f32.mrb[11].mxu1 }
 0x43e   :  { %v1727_v20 = vpop.eup %1726 }
 0x43f   :  { %v980_v21 = vsub.f32 %v1727_v20, %v1924_v34 }
 0x441   :  { %v982_v22 = vmul.f32 1.442695, %v980_v21 }
 0x442   :  { %v1729_v23 = vpop.eup %1728 }
 0x443   :  { %1730 = vpow2.f32 %v982_v22  ;;  %v981_v24 = vsub.f32 %v1729_v23, %v1927_v38 }
 0x445   :  { %v984_v25 = vmul.f32 1.442695, %v981_v24 }
 0x447   :  { %1732 = vpow2.f32 %v984_v25 }
 0x44d   :  { %v1731_v29 = vpop.eup %1730 }
 0x44e   :  { %1654 = vmatmul.mubr.msk.f32.vlgmr.msra.gmra.mrb[10].mxu0 %vm162_vm2, %v1731_v29  ;;  %v986_v30 = vsel %vm162_vm2, %v1731_v29, 0.0 }
 0x44f   :  { %1662 = vmatpush3.xpose.msk.msra.mxu0 %vm162_vm2, %v1151_v26  ;;  %987 = vadd.xlane.f32.xlu0 %v986_v30 }
 0x450   :  { %1663 = vmatprep.mubr.msk.f32.mxu0 %vm1835_vm1, %v1834_v8  ;;  %1671 = vmatprep.subr.mxu0 %v1834_v8 }
 0x451   :  { %v1733_v32 = vpop.eup %1732 }
 0x452   :  { %1659 = vmatmul.mubr.msk.f32.vlgmr.msra.gmra.mrb[12].mxu1 %vm162_vm2, %v1733_v32  ;;  %1664 = vmatmul.mubr.msk.f32.vlgmr.msra.gmra.mrb[12].mxu0 %vm162_vm2, %v1149_v28  ;;  %v989_v35 = vsel %vm162_vm2, %v1733_v32, 0.0 }
 0x453   :  { %1667 = vmatpush3.xpose.msk.msra.mxu1 %vm162_vm2, %v1229_v27  ;;  %1672 = vmatpush3.msra.mxu0 %v1319_v33 }
 0x454   :  { %990 = vadd.xlane.f32.xlu0 %v989_v35  ;;  %1668 = vmatprep.mubr.msk.f32.mxu1 %vm1835_vm1, %v1834_v8 }
 0x455   :  { %1676 = vmatprep.subr.mxu1 %v1834_v8  ;;  %1673 = vmatprep.mubr.msk.f32.mxu0 %vm1835_vm1, %v1834_v8 }
 0x456   :  { %1669 = vmatmul.mubr.msk.f32.vlgmr.msra.gmra.mrb[14].mxu1 %vm162_vm2, %v1227_v31 }
 0x457   :  { %1677 = vmatpush3.msra.mxu1 %v1395_v36  ;;  %1678 = vmatprep.mubr.msk.f32.mxu1 %vm1835_vm1, %v1834_v8 }
 0x521   :  { %v1064_v37 = vpop.f32.mrb[10].mxu0 }
 0x522   :  { %v1655_v39 = vpop.f32.mrb[11].mxu0 }
 0x525   :  { %v1140_v40 = vpop.f32.mrb[12].mxu1  ;;  %v1222_v41 = vpop.f32.mrb[12].mxu0 }
 0x526   :  { %1734 = vtanh.f32 %v1222_v41  ;;  %v1660_v42 = vpop.f32.mrb[13].mxu1  ;;  %v1665_v43 = vpop.f32.mrb[13].mxu0 }
 0x529   :  { %v1300_v44 = vpop.f32.mrb[14].mxu1 }
 0x52a   :  { %1736 = vtanh.f32 %v1300_v44  ;;  %v1670_v45 = vpop.f32.mrb[15].mxu1 }
 0x530   :  { %v1735_v47 = vpop.eup %1734 }
 0x531   :  { %v1306_v49 = vsub.f32 %v1735_v47, %v1924_v34  ;;  %v334_v34 = vsel %vm162_vm2, %v1930_v46, 0.0 }
 0x533   :  { %v1308_v50 = vmul.f32 1.442695, %v1306_v49 }
 0x534   :  { %v1737_v52 = vpop.eup %1736 }
 0x535   :  { %1738 = vpow2.f32 %v1308_v50  ;;  %v1307_v54 = vsub.f32 %v1737_v52, %v1927_v38  ;;  %v988_v38 = vpop.xlane.xlu0 %987 }
 0x537   :  { %v1310_v55 = vmul.f32 1.442695, %v1307_v54 }
 0x539   :  { %1740 = vpow2.f32 %v1310_v55  ;;  %v991_v61 = vpop.xlane.xlu0 %990 }
 0x53a   :  { %1742 = vrcp.f32 %v662_v58 }
 0x53b   :  { %1744 = vrcp.f32 %v988_v38 }
 0x53c   :  { %1746 = vrcp.f32 %v991_v61 }
 0x53d   :  { %1748 = vrcp.f32 %v665_v62 }
 0x53f   :  { %v1739_v8 = vpop.eup %1738 }
 0x540   :  { %1674 = vmatmul.mubr.msk.f32.vlgmr.msra.gmra.mrb[14].mxu0 %vm162_vm2, %v1739_v8  ;;  %v1312_v56 = vsel %vm162_vm2, %v1739_v8, 0.0 }
 0x541   :  { %1313 = vadd.xlane.f32.xlu1 %v1312_v56 }
 0x543   :  { %v1741_v57 = vpop.eup %1740 }
 0x544   :  { %1679 = vmatmul.mubr.msk.f32.vlgmr.msra.gmra.mrb[16].mxu1 %vm162_vm2, %v1741_v57  ;;  %v1315_v59 = vsel %vm162_vm2, %v1741_v57, 0.0  ;;  %v1743_v63 = vpop.eup %1742 }
 0x545   :  { %335 = vadd.xlane.f32.xlu1 %v334_v34  ;;  %1316 = vadd.xlane.f32.xlu0 %v1315_v59  ;;  %v820_v0 = vmul.f32 %v1743_v63, %v1980_v12  ;;  %v1745_v46 = vpop.eup %1744 }
 0x546   :  { %v1146_v1 = vmul.f32 %v1745_v46, %v1064_v37  ;;  %v1747_v2 = vpop.eup %1746 }
 0x547   :  { %v1749_v3 = vpop.eup %1748  ;;  %v1147_v4 = vmul.f32 %v1747_v2, %v1140_v40 }
 0x548   :  { %v821_v48 = vmul.f32 %v1749_v3, %v1982_v14 }
 0x549   :  { %338 = vadd.xlane.f32.xlu0 %v337_v60 }
 0x556   :  { %1476 = vrot.lane.b32.xlu1 %v820_v0, %s1832_s23 }
 0x55a   :  { %1484 = vrot.lane.b32.xlu1 %v1146_v1, %s1848_s2 }
 0x55e   :  { %1486 = vrot.lane.b32.xlu1 %v1147_v4, %s1848_s2 }
 0x55f   :  { %1478 = vrot.lane.b32.xlu0 %v821_v48, %s1832_s23 }
 0x5ce   :  { %v1314_v5 = vpop.xlane.xlu1 %1313 }
 0x5cf   :  { %1750 = vrcp.f32 %v1314_v5 }
 0x5d2   :  { %v1317_v6 = vpop.xlane.xlu0 %1316  ;;  %v336_v17 = vpop.xlane.xlu1 %335 }
 0x5d3   :  { %1752 = vrcp.f32 %v1317_v6 }
 0x5d4   :  { %1754 = vrcp.f32 %v336_v17 }
 0x5d6   :  { %v339_v14 = vpop.xlane.xlu0 %338  ;;  %v1477_v18 = vpop.permute.xlu1 %1476 }
 0x5d7   :  { %1756 = vrcp.f32 %v339_v14 }
 0x5d9   :  { %v1751_v7 = vpop.eup %1750 }
 0x5da   :  { %v1485_v22 = vpop.permute.xlu1 %1484  ;;  %v1479_v23 = vpop.permute.xlu0 %1478 }
 0x5dd   :  { %v1753_v12 = vpop.eup %1752 }
 0x5de   :  { %v1755_v19 = vpop.eup %1754  ;;  %v1487_v27 = vpop.permute.xlu1 %1486 }
 0x5df   :  { %v494_v20 = vmul.f32 %v1755_v19, %v1954_v51 }
 0x5e1   :  { %v1757_v21 = vpop.eup %1756  ;;  %v1498_v24 = vsel %vm162_vm2, %v494_v20, %v1477_v18 }
 0x5e2   :  { %v495_v25 = vmul.f32 %v1757_v21, %v1956_v53  ;;  %v1501_v26 = vsel %vm1500_vm3, %v1498_v24, %v1485_v22 }
 0x5e4   :  { %v1499_v29 = vsel %vm162_vm2, %v495_v25, %v1479_v23 }
 0x5e5   :  { %v1502_v51 = vsel %vm1500_vm3, %v1499_v29, %v1487_v27 }
 0x613   :  { %v1390_v9 = vpop.f32.mrb[14].mxu0 }
 0x614   :  { %v1472_v10 = vmul.f32 %v1751_v7, %v1390_v9  ;;  %v1675_v11 = vpop.f32.mrb[15].mxu0 }
 0x616   :  { %1492 = vrot.lane.b32.xlu0 %v1472_v10, %s1849_s24 }
 0x617   :  { %v1466_v13 = vpop.f32.mrb[16].mxu1 }
 0x618   :  { %v1473_v15 = vmul.f32 %v1753_v12, %v1466_v13  ;;  %v1680_v16 = vpop.f32.mrb[17].mxu1 }
 0x61a   :  { %1494 = vrot.lane.b32.xlu1 %v1473_v15, %s1849_s24 }
 0x688   :  { %v1493_v28 = vpop.permute.xlu0 %1492 }
 0x689   :  { %v1504_v30 = vsel %vm1503_vm4, %v1501_v26, %v1493_v28 }
 0x68a   :  { %1506 = vst.msk [vmem:[#allocation7] sm:$0xff] %vm49_vm0, %v1504_v30 }
 0x68c   :  { %v1495_v31 = vpop.permute.xlu1 %1494 }
 0x68d   :  { %v1505_v32 = vsel %vm1503_vm4, %v1502_v51, %v1495_v31 }
 0x68e   :  { %1507 = vst.msk [vmem:[#allocation7 + $0x8] sm:$0xff] %vm49_vm0, %v1505_v32 }
 0x68f   :  { %1813 = shalt.err (!%p1810_p6)
}
 0x690   :  { %s1814_s30 = scalar_lea.hbm %s2042_s3, 256 }
 0x691   :  { %p1815_p7 = scmp.ne.s32.totalorder %s2042_s3, %s1814_s30  ;;  %p1818_p8 = scmp.lt.u32.totalorder %s1814_s30, %s2042_s3 }
 0x693   :  { %p1820_p9 = pnand %p1818_p8, %p1815_p7 }
 0x695   :  { %1823 = shalt.err (!%p1820_p9)
}
 0x696   :  { %1519 = dma.vmem_to_hbm [thread:$0]  %s1514_s26, 256, %s2042_s3, [#allocation4], %s1831_s22, %s1831_s22, %s1832_s23  }
 0x697   :  { %1828 = dma.done.wait [#allocation4], 256  }
 0x698   :  { %1829 = vsyncadd [#allocation4], 4294967040 }
 0x699   :  { %1523 = vsyncpa [#allocation3], 1 }
 0x69a   :  { %1524 = vsyncpa [#allocation6], 1 }
 0x69b   :  { %1525 = vsyncpa [#allocation4], 1 }

</bundles_post_ra>
